<compile_context>
chip_gen: v7x
topology: tpu7x:2x2x1
jax: 0.10.0
libtpu: 0.0.40
codegen_flags: <defaults>
</compile_context>

<pallas_src>
import functools

import jax
import jax.numpy as jnp
from jax.experimental import pallas as pl
from jax.experimental.pallas import tpu as pltpu


def _kldiv_kernel(logits_ref, targets_ref, rowkl_ref,
                  m_x, s_x, m_y, s_y, acc,
                  *, inv_T, C, tile_c, need_col_mask):
    j = pl.program_id(1)                      # class-tile index (reduction axis)

    @pl.when(j == 0)
    def _():
        m_x[...] = jnp.full_like(m_x, -1e30)
        m_y[...] = jnp.full_like(m_y, -1e30)
        s_x[...] = jnp.zeros_like(s_x)
        s_y[...] = jnp.zeros_like(s_y)
        acc[...] = jnp.zeros_like(acc)

    x = logits_ref[...].astype(jnp.float32) * inv_T
    y = targets_ref[...].astype(jnp.float32) * inv_T

    if need_col_mask:                         # static: only when C % tile_c != 0
        cols = j * tile_c + jax.lax.broadcasted_iota(jnp.int32, x.shape, 1)
        valid = cols < C
        neg = jnp.float32(-1e30)
        x = jnp.where(valid, x, neg)
        y = jnp.where(valid, y, neg)

    # Online log-sum-exp for x = logits / T.
    m_x_new = jnp.maximum(m_x[...], jnp.max(x, axis=1, keepdims=True))
    s_x[...] = (s_x[...] * jnp.exp(m_x[...] - m_x_new)
                + jnp.sum(jnp.exp(x - m_x_new), axis=1, keepdims=True))
    m_x[...] = m_x_new

    # Online log-sum-exp for y = targets / T plus the exp-weighted sum of (y - x).
    m_y_new = jnp.maximum(m_y[...], jnp.max(y, axis=1, keepdims=True))
    corr = jnp.exp(m_y[...] - m_y_new)
    y_exp = jnp.exp(y - m_y_new)
    s_y[...] = s_y[...] * corr + jnp.sum(y_exp, axis=1, keepdims=True)
    acc[...] = acc[...] * corr + jnp.sum(y_exp * (y - x), axis=1, keepdims=True)
    m_y[...] = m_y_new

    @pl.when(j == pl.num_programs(1) - 1)
    def _():
        lse_x = m_x[...] + jnp.log(s_x[...])
        lse_y = m_y[...] + jnp.log(s_y[...])
        rowkl_ref[...] = acc[...] / s_y[...] + lse_x - lse_y


def _round_up(x, m):
    return -(-x // m) * m


def _choose_tiles(N, C, itemsize, tile_n=None, tile_c=None):
    """Tile sizes from a per-element VMEM cost model.

    Cost per tile element: 2 inputs x 2 pipeline buffers x itemsize (block buffers)
    + ~5 live full-tile f32 temporaries in the kernel body.  The 20 MiB budget keeps
    this kernel inside v7x's 32 MiB scoped (64 MiB physical per-TC) VMEM while still
    giving multi-MiB blocks on v5e/v6e (HBM-bound regime).
    """
    bytes_per_elem = 4 * itemsize + 5 * 4
    budget = 20 * 1024 * 1024
    max_elems = max(8 * 128, budget // bytes_per_elem)

    # Class-dim tile: full C when it fits with >= 8 rows, else a lane-aligned slice
    # (multiple of 128 required whenever tile_c != C).
    if tile_c is None:
        tile_c = C if 8 * C <= max_elems else max(128, ((max_elems // 8) // 128) * 128)
    if tile_c >= C:
        tile_c = C
    else:
        tile_c = max(128, (tile_c // 128) * 128)
        if tile_c >= C:
            tile_c = C

    if tile_n is None:
        tile_n = max(8, ((max_elems // tile_c) // 8) * 8)
    else:
        tile_n = max(8, (tile_n // 8) * 8)

    if tile_n >= N:
        if N >= 16:
            # Guarantee >= 2 row tiles so the "parallel" axis shards across both
            # TensorCores on v7x.
            tile_n = _round_up(-(-N // 2), 8)
        else:
            tile_n = N            # single full-extent row block (always legal tiling)
    return tile_n, tile_c


def kldiv_pallas(logits, targets, T=1.0, reduction='batchmean',
                 tile_n=None, tile_c=None):
    assert logits.shape == targets.shape and logits.ndim == 2
    assert reduction in ('batchmean', 'sum', 'mean')
    N, C = logits.shape

    itemsize = max(jnp.dtype(logits.dtype).itemsize,
                   jnp.dtype(targets.dtype).itemsize)
    tile_n, tile_c = _choose_tiles(N, C, itemsize, tile_n, tile_c)
    n_row_tiles = -(-N // tile_n)
    n_col_tiles = -(-C // tile_c)

    kernel = functools.partial(
        _kldiv_kernel,
        inv_T=1.0 / float(T),
        C=C,
        tile_c=tile_c,
        need_col_mask=(C % tile_c != 0),
    )

    row_kl = pl.pallas_call(
        kernel,
        out_shape=jax.ShapeDtypeStruct((n_row_tiles * tile_n, 1), jnp.float32),
        grid=(n_row_tiles, n_col_tiles),
        in_specs=[
            pl.BlockSpec((tile_n, tile_c), lambda i, j: (i, j)),
            pl.BlockSpec((tile_n, tile_c), lambda i, j: (i, j)),
        ],
        # Output block index depends only on the row tile -> stays resident across the
        # class ("arbitrary") axis and is written once at the last class tile.
        out_specs=pl.BlockSpec((tile_n, 1), lambda i, j: (i, 0)),
        scratch_shapes=[pltpu.VMEM((tile_n, 1), jnp.float32)] * 5,
        compiler_params=pltpu.CompilerParams(
            dimension_semantics=("parallel", "arbitrary"),
            vmem_limit_bytes=32 * 1024 * 1024,
        ),
    )(logits, targets)

    # Tail rows (N % tile_n) are undefined -> slice them off before the tiny reduction.
    total = jnp.sum(row_kl[:N, 0]) * (float(T) * float(T))
    if reduction == 'batchmean':
        return total / N
    if reduction == 'mean':
        return total / (N * C)
    return total  # 'sum'


def kldiv_ref(logits, targets, T=1.0):
    # Pure-JAX reference (matches the PyTorch module with reduction='batchmean').
    q = jax.nn.log_softmax(logits / T, axis=1)
    p = jax.nn.softmax(targets / T, axis=1)
    log_p = jax.nn.log_softmax(targets / T, axis=1)
    return jnp.sum(p * (log_p - q)) / logits.shape[0] * (T * T)


if __name__ == "__main__":
    key = jax.random.PRNGKey(0)
    k1, k2, k3, k4, k5, k6 = jax.random.split(key, 6)

    # Case 1: small (batch=8, classes=32) single-tile path, temperature T=2.
    N1, C1 = 8, 32
    l1 = jax.random.normal(k1, (N1, C1), dtype=jnp.float32)
    t1 = jax.random.normal(k2, (N1, C1), dtype=jnp.float32)
    o1 = jax.block_until_ready(kldiv_pallas(l1, t1, T=2.0))
    r1 = kldiv_ref(l1, t1, T=2.0)
    assert jnp.allclose(o1, r1, atol=1e-4, rtol=1e-4), (o1, r1)

    # Case 2: multi row-tile + multi class-tile with row AND column tails
    # (exercises the online log-sum-exp path and in-kernel column masking).
    N2, C2 = 20, 320
    l2 = jax.random.normal(k3, (N2, C2), dtype=jnp.float32)
    t2 = jax.random.normal(k4, (N2, C2), dtype=jnp.float32)
    o2 = jax.block_until_ready(kldiv_pallas(l2, t2, T=1.0, tile_n=8, tile_c=128))
    r2 = kldiv_ref(l2, t2, T=1.0)
    assert jnp.allclose(o2, r2, atol=1e-4, rtol=1e-4), (o2, r2)

    # Case 3: default tile chooser with N >= 16 -> at least 2 "parallel" row tiles.
    N3, C3 = 16, 128
    l3 = jax.random.normal(k5, (N3, C3), dtype=jnp.float32)
    t3 = jax.random.normal(k6, (N3, C3), dtype=jnp.float32)
    o3 = jax.block_until_ready(kldiv_pallas(l3, t3, T=4.0))
    r3 = kldiv_ref(l3, t3, T=4.0)
    assert jnp.allclose(o3, r3, atol=1e-4, rtol=1e-4), (o3, r3)

    print("KERNEL_OK")
</pallas_src>

<mosaic_0001>
module attributes {stable_mosaic.version = 11 : i64} {
  func.func @_kldiv_kernel(%arg0: i32, %arg1: i32, %arg2: memref<8x32xf32, #tpu.memory_space<vmem>>, %arg3: memref<8x32xf32, #tpu.memory_space<vmem>>, %arg4: memref<8x1xf32, #tpu.memory_space<vmem>>, %arg5: memref<8x1xf32, #tpu.memory_space<vmem>>, %arg6: memref<8x1xf32, #tpu.memory_space<vmem>>, %arg7: memref<8x1xf32, #tpu.memory_space<vmem>>, %arg8: memref<8x1xf32, #tpu.memory_space<vmem>>, %arg9: memref<8x1xf32, #tpu.memory_space<vmem>>) attributes {dimension_semantics = [#tpu.dimension_semantics<parallel>, #tpu.dimension_semantics<arbitrary>], iteration_bounds = array<i64: 1, 1>, scalar_prefetch = 0 : i64, scratch_operands = 5 : i64, tpu.core_type = #tpu.core_type<tc>, window_params = [{transform_indices = @transform_0, window_bounds = array<i64: 8, 32>}, {transform_indices = @transform_1, window_bounds = array<i64: 8, 32>}, {transform_indices = @transform_2, window_bounds = array<i64: 8, 1>}]} {
    %c0_i32 = arith.constant 0 : i32
    %0 = arith.cmpi eq, %arg1, %c0_i32 : i32
    %1 = arith.extui %0 : i1 to i32
    %c0_i32_0 = arith.constant 0 : i32
    %2 = arith.cmpi ne, %1, %c0_i32_0 : i32
    scf.if %2 {
      %cst_36 = arith.constant -1.000000e+30 : f32
      %54 = vector.broadcast %cst_36 : f32 to vector<8x1xf32>
      %c0_37 = arith.constant 0 : index
      %c0_38 = arith.constant 0 : index
      %55 = vector.load %arg5[%c0_37, %c0_38] : memref<8x1xf32, #tpu.memory_space<vmem>>, vector<8x1xf32>
      tpu.vector_store %arg5[%c0_37, %c0_38], %54 {strides = array<i32>} : memref<8x1xf32, #tpu.memory_space<vmem>>, vector<8x1xf32>,
      %cst_39 = arith.constant -1.000000e+30 : f32
      %56 = vector.broadcast %cst_39 : f32 to vector<8x1xf32>
      %c0_40 = arith.constant 0 : index
      %c0_41 = arith.constant 0 : index
      %57 = vector.load %arg7[%c0_40, %c0_41] : memref<8x1xf32, #tpu.memory_space<vmem>>, vector<8x1xf32>
      tpu.vector_store %arg7[%c0_40, %c0_41], %56 {strides = array<i32>} : memref<8x1xf32, #tpu.memory_space<vmem>>, vector<8x1xf32>,
      %cst_42 = arith.constant 0.000000e+00 : f32
      %58 = vector.broadcast %cst_42 : f32 to vector<8x1xf32>
      %c0_43 = arith.constant 0 : index
      %c0_44 = arith.constant 0 : index
      %59 = vector.load %arg6[%c0_43, %c0_44] : memref<8x1xf32, #tpu.memory_space<vmem>>, vector<8x1xf32>
      tpu.vector_store %arg6[%c0_43, %c0_44], %58 {strides = array<i32>} : memref<8x1xf32, #tpu.memory_space<vmem>>, vector<8x1xf32>,
      %cst_45 = arith.constant 0.000000e+00 : f32
      %60 = vector.broadcast %cst_45 : f32 to vector<8x1xf32>
      %c0_46 = arith.constant 0 : index
      %c0_47 = arith.constant 0 : index
      %61 = vector.load %arg8[%c0_46, %c0_47] : memref<8x1xf32, #tpu.memory_space<vmem>>, vector<8x1xf32>
      tpu.vector_store %arg8[%c0_46, %c0_47], %60 {strides = array<i32>} : memref<8x1xf32, #tpu.memory_space<vmem>>, vector<8x1xf32>,
      %cst_48 = arith.constant 0.000000e+00 : f32
      %62 = vector.broadcast %cst_48 : f32 to vector<8x1xf32>
      %c0_49 = arith.constant 0 : index
      %c0_50 = arith.constant 0 : index
      %63 = vector.load %arg9[%c0_49, %c0_50] : memref<8x1xf32, #tpu.memory_space<vmem>>, vector<8x1xf32>
      tpu.vector_store %arg9[%c0_49, %c0_50], %62 {strides = array<i32>} : memref<8x1xf32, #tpu.memory_space<vmem>>, vector<8x1xf32>,
    } else {
    }
    %c0 = arith.constant 0 : index
    %c0_1 = arith.constant 0 : index
    %3 = vector.load %arg2[%c0, %c0_1] : memref<8x32xf32, #tpu.memory_space<vmem>>, vector<8x32xf32>
    %cst = arith.constant 5.000000e-01 : f32
    %4 = vector.broadcast %cst : f32 to vector<8x32xf32>
    %5 = arith.mulf %3, %4 : vector<8x32xf32>
    %c0_2 = arith.constant 0 : index
    %c0_3 = arith.constant 0 : index
    %6 = vector.load %arg3[%c0_2, %c0_3] : memref<8x32xf32, #tpu.memory_space<vmem>>, vector<8x32xf32>
    %cst_4 = arith.constant 5.000000e-01 : f32
    %7 = vector.broadcast %cst_4 : f32 to vector<8x32xf32>
    %8 = arith.mulf %6, %7 : vector<8x32xf32>
    %c0_5 = arith.constant 0 : index
    %c0_6 = arith.constant 0 : index
    %9 = vector.load %arg5[%c0_5, %c0_6] : memref<8x1xf32, #tpu.memory_space<vmem>>, vector<8x1xf32>
    %cst_7 = arith.constant dense<0xFF800000> : vector<8xf32>
    %10 = vector.multi_reduction <maximumf>, %5, %cst_7 [1] : vector<8x32xf32> to vector<8xf32>
    %11 = vector.shape_cast %10 : vector<8xf32> to vector<8x1xf32>
    %12 = arith.maximumf %9, %11 : vector<8x1xf32>
    %c0_8 = arith.constant 0 : index
    %c0_9 = arith.constant 0 : index
    %13 = vector.load %arg6[%c0_8, %c0_9] : memref<8x1xf32, #tpu.memory_space<vmem>>, vector<8x1xf32>
    %c0_10 = arith.constant 0 : index
    %c0_11 = arith.constant 0 : index
    %14 = vector.load %arg5[%c0_10, %c0_11] : memref<8x1xf32, #tpu.memory_space<vmem>>, vector<8x1xf32>
    %15 = arith.subf %14, %12 : vector<8x1xf32>
    %16 = math.exp %15 : vector<8x1xf32>
    %17 = arith.mulf %13, %16 : vector<8x1xf32>
    %18 = vector.broadcast %12 : vector<8x1xf32> to vector<8x32xf32>
    %19 = arith.subf %5, %18 : vector<8x32xf32>
    %20 = math.exp %19 : vector<8x32xf32>
    %cst_12 = arith.constant dense<0.000000e+00> : vector<8xf32>
    %21 = vector.multi_reduction <add>, %20, %cst_12 [1] : vector<8x32xf32> to vector<8xf32>
    %22 = vector.shape_cast %21 : vector<8xf32> to vector<8x1xf32>
    %23 = arith.addf %17, %22 : vector<8x1xf32>
    %c0_13 = arith.constant 0 : index
    %c0_14 = arith.constant 0 : index
    %24 = vector.load %arg6[%c0_13, %c0_14] : memref<8x1xf32, #tpu.memory_space<vmem>>, vector<8x1xf32>
    tpu.vector_store %arg6[%c0_13, %c0_14], %23 {strides = array<i32>} : memref<8x1xf32, #tpu.memory_space<vmem>>, vector<8x1xf32>,
    %c0_15 = arith.constant 0 : index
    %c0_16 = arith.constant 0 : index
    %25 = vector.load %arg5[%c0_15, %c0_16] : memref<8x1xf32, #tpu.memory_space<vmem>>, vector<8x1xf32>
    tpu.vector_store %arg5[%c0_15, %c0_16], %12 {strides = array<i32>} : memref<8x1xf32, #tpu.memory_space<vmem>>, vector<8x1xf32>,
    %c0_17 = arith.constant 0 : index
    %c0_18 = arith.constant 0 : index
    %26 = vector.load %arg7[%c0_17, %c0_18] : memref<8x1xf32, #tpu.memory_space<vmem>>, vector<8x1xf32>
    %cst_19 = arith.constant dense<0xFF800000> : vector<8xf32>
    %27 = vector.multi_reduction <maximumf>, %8, %cst_19 [1] : vector<8x32xf32> to vector<8xf32>
    %28 = vector.shape_cast %27 : vector<8xf32> to vector<8x1xf32>
    %29 = arith.maximumf %26, %28 : vector<8x1xf32>
    %c0_20 = arith.constant 0 : index
    %c0_21 = arith.constant 0 : index
    %30 = vector.load %arg7[%c0_20, %c0_21] : memref<8x1xf32, #tpu.memory_space<vmem>>, vector<8x1xf32>
    %31 = arith.subf %30, %29 : vector<8x1xf32>
    %32 = math.exp %31 : vector<8x1xf32>
    %33 = vector.broadcast %29 : vector<8x1xf32> to vector<8x32xf32>
    %34 = arith.subf %8, %33 : vector<8x32xf32>
    %35 = math.exp %34 : vector<8x32xf32>
    %c0_22 = arith.constant 0 : index
    %c0_23 = arith.constant 0 : index
    %36 = vector.load %arg8[%c0_22, %c0_23] : memref<8x1xf32, #tpu.memory_space<vmem>>, vector<8x1xf32>
    %37 = arith.mulf %36, %32 : vector<8x1xf32>
    %cst_24 = arith.constant dense<0.000000e+00> : vector<8xf32>
    %38 = vector.multi_reduction <add>, %35, %cst_24 [1] : vector<8x32xf32> to vector<8xf32>
    %39 = vector.shape_cast %38 : vector<8xf32> to vector<8x1xf32>
    %40 = arith.addf %37, %39 : vector<8x1xf32>
    %c0_25 = arith.constant 0 : index
    %c0_26 = arith.constant 0 : index
    %41 = vector.load %arg8[%c0_25, %c0_26] : memref<8x1xf32, #tpu.memory_space<vmem>>, vector<8x1xf32>
    tpu.vector_store %arg8[%c0_25, %c0_26], %40 {strides = array<i32>} : memref<8x1xf32, #tpu.memory_space<vmem>>, vector<8x1xf32>,
    %c0_27 = arith.constant 0 : index
    %c0_28 = arith.constant 0 : index
    %42 = vector.load %arg9[%c0_27, %c0_28] : memref<8x1xf32, #tpu.memory_space<vmem>>, vector<8x1xf32>
    %43 = arith.mulf %42, %32 : vector<8x1xf32>
    %44 = arith.subf %8, %5 : vector<8x32xf32>
    %45 = arith.mulf %35, %44 : vector<8x32xf32>
    %cst_29 = arith.constant dense<0.000000e+00> : vector<8xf32>
    %46 = vector.multi_reduction <add>, %45, %cst_29 [1] : vector<8x32xf32> to vector<8xf32>
    %47 = vector.shape_cast %46 : vector<8xf32> to vector<8x1xf32>
    %48 = arith.addf %43, %47 : vector<8x1xf32>
    %c0_30 = arith.constant 0 : index
    %c0_31 = arith.constant 0 : index
    %49 = vector.load %arg9[%c0_30, %c0_31] : memref<8x1xf32, #tpu.memory_space<vmem>>, vector<8x1xf32>
    tpu.vector_store %arg9[%c0_30, %c0_31], %48 {strides = array<i32>} : memref<8x1xf32, #tpu.memory_space<vmem>>, vector<8x1xf32>,
    %c0_32 = arith.constant 0 : index
    %c0_33 = arith.constant 0 : index
    %50 = vector.load %arg7[%c0_32, %c0_33] : memref<8x1xf32, #tpu.memory_space<vmem>>, vector<8x1xf32>
    tpu.vector_store %arg7[%c0_32, %c0_33], %29 {strides = array<i32>} : memref<8x1xf32, #tpu.memory_space<vmem>>, vector<8x1xf32>,
    %c0_i32_34 = arith.constant 0 : i32
    %51 = arith.cmpi eq, %arg1, %c0_i32_34 : i32
    %52 = arith.extui %51 : i1 to i32
    %c0_i32_35 = arith.constant 0 : i32
    %53 = arith.cmpi ne, %52, %c0_i32_35 : i32
    scf.if %53 {
      %c0_36 = arith.constant 0 : index
      %c0_37 = arith.constant 0 : index
      %54 = vector.load %arg5[%c0_36, %c0_37] : memref<8x1xf32, #tpu.memory_space<vmem>>, vector<8x1xf32>
      %c0_38 = arith.constant 0 : index
      %c0_39 = arith.constant 0 : index
      %55 = vector.load %arg6[%c0_38, %c0_39] : memref<8x1xf32, #tpu.memory_space<vmem>>, vector<8x1xf32>
      %56 = math.log %55 : vector<8x1xf32>
      %57 = arith.addf %54, %56 : vector<8x1xf32>
      %c0_40 = arith.constant 0 : index
      %c0_41 = arith.constant 0 : index
      %58 = vector.load %arg7[%c0_40, %c0_41] : memref<8x1xf32, #tpu.memory_space<vmem>>, vector<8x1xf32>
      %c0_42 = arith.constant 0 : index
      %c0_43 = arith.constant 0 : index
      %59 = vector.load %arg8[%c0_42, %c0_43] : memref<8x1xf32, #tpu.memory_space<vmem>>, vector<8x1xf32>
      %60 = math.log %59 : vector<8x1xf32>
      %61 = arith.addf %58, %60 : vector<8x1xf32>
      %c0_44 = arith.constant 0 : index
      %c0_45 = arith.constant 0 : index
      %62 = vector.load %arg9[%c0_44, %c0_45] : memref<8x1xf32, #tpu.memory_space<vmem>>, vector<8x1xf32>
      %c0_46 = arith.constant 0 : index
      %c0_47 = arith.constant 0 : index
      %63 = vector.load %arg8[%c0_46, %c0_47] : memref<8x1xf32, #tpu.memory_space<vmem>>, vector<8x1xf32>
      %64 = arith.divf %62, %63 : vector<8x1xf32>
      %65 = arith.addf %64, %57 : vector<8x1xf32>
      %66 = arith.subf %65, %61 : vector<8x1xf32>
      %c0_48 = arith.constant 0 : index
      %c0_49 = arith.constant 0 : index
      %67 = vector.load %arg4[%c0_48, %c0_49] : memref<8x1xf32, #tpu.memory_space<vmem>>, vector<8x1xf32>
      tpu.vector_store %arg4[%c0_48, %c0_49], %66 {strides = array<i32>} : memref<8x1xf32, #tpu.memory_space<vmem>>, vector<8x1xf32>,
    } else {
    }
    return
  }
  func.func @transform_0(%arg0: i32, %arg1: i32) -> (i32, i32) {
    %c0_i32 = arith.constant 0 : i32
    return %arg0, %arg1 : i32, i32
  }
  func.func @transform_1(%arg0: i32, %arg1: i32) -> (i32, i32) {
    %c0_i32 = arith.constant 0 : i32
    return %arg0, %arg1 : i32, i32
  }
  func.func @transform_2(%arg0: i32, %arg1: i32) -> (i32, i32) {
    %c0_i32 = arith.constant 0 : i32
    %c0_i32_0 = arith.constant 0 : i32
    return %arg0, %c0_i32 : i32, i32
  }
}

</mosaic_0001>

<bundles_post_ra>
// kernel: tpu_custom_call.1
= control target key start
LH: loop header
LB: loop body
LE: loop exit
PB: predicated region body
PF: predicated region fallthrough
CT: control target
= control target key end

     0   :  { %7 = vsyncpa [#allocation8], 0  ;;  %s265_s0 = inlined_call_operand.hbm [shape: f32[8,32], index: 0, kind: input, shape index: {}]   ;;  %s266_s1 = inlined_call_operand.hbm [shape: f32[8,32], index: 1, kind: input, shape index: {}]   ;;  %s267_s2 = inlined_call_operand.vmem [shape: f32[8,1], index: 2, kind: output, shape index: {}]  }
   0x1   :  { %8 = vsyncpa [#allocation10], 0  ;;  %s202_s9 = smov [#allocation7]   ;;  %s203_s11 = smov [#allocation9]  }
   0x2   :  { %s15_s10 = sshll.u32 %s202_s9, 4  ;;  %s25_s12 = sshll.u32 %s203_s11, 4  ;;  %s16_s10 = int_to_ptr.vmem [resolvable:$true] %s15_s10  ;;  %s26_s12 = int_to_ptr.vmem [resolvable:$true] %s25_s12 }
   0x3   :  { %s154_s15 = scalar_lea.hbm %s265_s0, 128 }
   0x4   :  { %p155_p0 = scmp.ne.s32.totalorder %s265_s0, %s154_s15  ;;  %p158_p1 = scmp.lt.u32.totalorder %s154_s15, %s265_s0 }
   0x6   :  { %p160_p2 = pnand %p158_p1, %p155_p0 }
   0x8   :  { %163 = shalt.err (!%p160_p2)
}
   0x9   :  { %s164_s20 = scalar_lea.vmem %s16_s10, 128  ;;  %p169_p4 = scmp.lt.s32.totalorder %s16_s10, %s16_s10 }
   0xa   :  { %p165_p3 = scmp.ne.s32.totalorder %s16_s10, %s164_s20  ;;  %p170_p5 = scmp.lt.s32.totalorder %s164_s20, %s164_s20 }
   0xc   :  { %p171_p6 = por %p170_p5, %p169_p4 }
   0xe   :  { %p172_p7 = pnand %p171_p6, %p165_p3 }
  0x10   :  { %175 = shalt.err (!%p172_p7)
}
  0x11   :  { %18 = dma.hbm_to_vmem [thread:$0]  %s265_s0, 128, %s16_s10, [#allocation8]  }
  0x12   :  { %s176_s25 = scalar_lea.hbm %s266_s1, 128 }
  0x13   :  { %p177_p8 = scmp.ne.s32.totalorder %s266_s1, %s176_s25  ;;  %p180_p9 = scmp.lt.u32.totalorder %s176_s25, %s266_s1 }
  0x15   :  { %p182_p10 = pnand %p180_p9, %p177_p8 }
  0x17   :  { %185 = shalt.err (!%p182_p10)
}
  0x18   :  { %s186_s30 = scalar_lea.vmem %s26_s12, 128  ;;  %p191_p12 = scmp.lt.s32.totalorder %s26_s12, %s26_s12 }
  0x19   :  { %p187_p11 = scmp.ne.s32.totalorder %s26_s12, %s186_s30  ;;  %p192_p13 = scmp.lt.s32.totalorder %s186_s30, %s186_s30 }
  0x1b   :  { %p193_p0 = por %p192_p13, %p191_p12 }
  0x1d   :  { %p194_p1 = pnand %p193_p0, %p187_p11 }
  0x1f   :  { %197 = shalt.err (!%p194_p1)
}
  0x20   :  { %28 = dma.hbm_to_vmem [thread:$0]  %s266_s1, 128, %s26_s12, [#allocation10]  }
  0x21   :  { %198 = dma.done.wait [#allocation8], 128  }
  0x22   :  { %199 = vsyncadd [#allocation8], 4294967168 }
  0x23   :  { %200 = dma.done.wait [#allocation10], 128  }
  0x24   :  { %201 = vsyncadd [#allocation10], 4294967168  ;;  %vm39_vm0 = vcmask 7168   ;;  %v204_v0 = vmov -1e+30   ;;  %v45_v1 = vld [vmem:[#allocation7] sm:$0xff] }
  0x25   :  { %40 = vst.msk [vmem:[#allocation2] sm:$0xff] %vm39_vm0, %v204_v0  ;;  %41 = vst.msk [vmem:[#allocation4] sm:$0xff] %vm39_vm0, %v204_v0  ;;  %vm50_vm1 = vcmask 261120   ;;  %v47_v2 = vld [vmem:[#allocation9] sm:$0xff]  ;;  %v46_v3 = vmul.f32 0.5, %v45_v1  ;;  %v205_v7 = vmov 0  }
  0x26   :  { %v48_v4 = vmul.f32 0.5, %v47_v2  ;;  %138 = vset.pattern.permute.xlu1 %v205_v7  ;;  %139 = vset.pattern.permute.xlu0 %v205_v7  ;;  %v206_v8 = vmov 0.0  }
  0x27   :  { %v51_v5 = vsel %vm50_vm1, %v46_v3, -inf  ;;  %42 = vst.msk [vmem:[#allocation3] sm:$0xff] %vm39_vm0, %v206_v8  ;;  %43 = vst.msk [vmem:[#allocation5] sm:$0xff] %vm39_vm0, %v206_v8 }
  0x28   :  { %52 = vmax.xlane.f32.xlu0 %v51_v5  ;;  %v76_v6 = vsel %vm50_vm1, %v48_v4, -inf  ;;  %44 = vst.msk [vmem:[#allocation6] sm:$0xff] %vm39_vm0, %v206_v8  ;;  %v100_v25 = vsub.f32 %v48_v4, %v46_v3 }
  0x2c   :  { %77 = vmax.xlane.f32.xlu0 %v76_v6  ;;  %v49_v9 = vld [vmem:[#allocation2] sm:$0xff]  ;;  %v75_v12 = vld [vmem:[#allocation4] sm:$0xff] }
  0x2e   :  { %v55_v33 = vld [vmem:[#allocation3] sm:$0xff]  ;;  %v91_v37 = vld [vmem:[#allocation5] sm:$0xff] }
  0x2f   :  { %v98_v39 = vld [vmem:[#allocation6] sm:$0xff] }
  0xb5   :  { %v53_v10 = vpop.xlane.xlu0 %52 }
  0xb6   :  { %v54_v11 = vmax.f32 %v49_v9, %v53_v10 }
  0xb8   :  { %v56_v13 = vsub.f32 %v49_v9, %v54_v11  ;;  %74 = vst.msk [vmem:[#allocation2] sm:$0xff] %vm39_vm0, %v54_v11  ;;  %62 = vperm.xlu1 %138, %v54_v11  }
  0xb9   :  { %v78_v14 = vpop.xlane.xlu0 %77 }
  0xba   :  { %v79_v15 = vmax.f32 %v75_v12, %v78_v14  ;;  %v57_v30 = vmul.f32 1.442695, %v56_v13 }
  0xbc   :  { %v80_v16 = vsub.f32 %v75_v12, %v79_v15  ;;  %107 = vst.msk [vmem:[#allocation4] sm:$0xff] %vm39_vm0, %v79_v15  ;;  %85 = vperm.xlu1 %138, %v79_v15  }
  0xbe   :  { %v81_v31 = vmul.f32 1.442695, %v80_v16 }
  0xbf   :  { %v111_v52 = vld [vmem:[#allocation2] sm:$0xff] }
  0xc3   :  { %v116_v55 = vld [vmem:[#allocation4] sm:$0xff] }
 0x137   :  { %v63_v17 = vpop.permute.xlu1 %62 }
 0x138   :  { %v65_v18 = vsub.f32 %v46_v3, %v63_v17 }
 0x13a   :  { %v66_v19 = vmul.f32 1.442695, %v65_v18 }
 0x13b   :  { %v86_v20 = vpop.permute.xlu1 %85 }
 0x13c   :  { %140 = vpow2.f32 %v66_v19  ;;  %v88_v21 = vsub.f32 %v48_v4, %v86_v20 }
 0x13e   :  { %v89_v22 = vmul.f32 1.442695, %v88_v21 }
 0x140   :  { %142 = vpow2.f32 %v89_v22 }
 0x141   :  { %144 = vpow2.f32 %v57_v30 }
 0x142   :  { %146 = vpow2.f32 %v81_v31 }
 0x146   :  { %v141_v23 = vpop.eup %140 }
 0x147   :  { %v68_v24 = vsel %vm50_vm1, %v141_v23, 0.0 }
 0x148   :  { %69 = vadd.xlane.f32.xlu0 %v68_v24 }
 0x14a   :  { %v143_v26 = vpop.eup %142 }
 0x14b   :  { %v93_v27 = vsel %vm50_vm1, %v143_v26, 0.0  ;;  %v101_v28 = vmul.f32 %v143_v26, %v100_v25  ;;  %v145_v32 = vpop.eup %144 }
 0x14c   :  { %94 = vadd.xlane.f32.xlu1 %v93_v27  ;;  %v59_v34 = vmul.f32 %v145_v32, %v55_v33  ;;  %v147_v35 = vpop.eup %146 }
 0x14d   :  { %v102_v29 = vsel %vm50_vm1, %v101_v28, 0.0  ;;  %v92_v40 = vmul.f32 %v147_v35, %v91_v37  ;;  %v99_v43 = vmul.f32 %v147_v35, %v98_v39 }
 0x14e   :  { %103 = vadd.xlane.f32.xlu0 %v102_v29 }
 0x1d5   :  { %v70_v36 = vpop.xlane.xlu0 %69 }
 0x1d6   :  { %v71_v38 = vadd.f32 %v70_v36, %v59_v34 }
 0x1d8   :  { %73 = vst.msk [vmem:[#allocation3] sm:$0xff] %vm39_vm0, %v71_v38 }
 0x1d9   :  { %v95_v41 = vpop.xlane.xlu1 %94 }
 0x1da   :  { %v96_v42 = vadd.f32 %v95_v41, %v92_v40 }
 0x1db   :  { %v104_v44 = vpop.xlane.xlu0 %103 }
 0x1dc   :  { %97 = vst.msk [vmem:[#allocation5] sm:$0xff] %vm39_vm0, %v96_v42  ;;  %v105_v45 = vadd.f32 %v104_v44, %v99_v43 }
 0x1de   :  { %106 = vst.msk [vmem:[#allocation6] sm:$0xff] %vm39_vm0, %v105_v45 }
 0x1df   :  { %v112_v46 = vld [vmem:[#allocation3] sm:$0xff] }
 0x1e0   :  { %148 = vlog2.f32 %v112_v46 }
 0x1e3   :  { %v117_v47 = vld [vmem:[#allocation5] sm:$0xff] }
 0x1e4   :  { %150 = vlog2.f32 %v117_v47 }
 0x1e5   :  { %152 = vrcp.f32 %v117_v47  ;;  %v121_v54 = vld [vmem:[#allocation6] sm:$0xff] }
 0x1ea   :  { %v149_v48 = vpop.eup %148 }
 0x1eb   :  { %v114_v49 = vmul.f32 0.6931472, %v149_v48 }
 0x1ed   :  { %v115_v56 = vadd.f32 %v114_v49, %v111_v52 }
 0x1ee   :  { %v151_v50 = vpop.eup %150 }
 0x1ef   :  { %v153_v51 = vpop.eup %152  ;;  %v119_v53 = vmul.f32 0.6931472, %v151_v50 }
 0x1f0   :  { %v123_v57 = vmul.f32 %v153_v51, %v121_v54 }
 0x1f1   :  { %v120_v58 = vadd.f32 %v119_v53, %v116_v55 }
 0x1f2   :  { %v124_v59 = vadd.f32 %v123_v57, %v115_v56 }
 0x1f4   :  { %v125_v60 = vsub.f32 %v124_v59, %v120_v58 }
 0x1f6   :  { %126 = vst.msk [vmem:[%s267_s2] sm:$0xff] %vm39_vm0, %v125_v60 }
 0x1f7   :  { %131 = vsyncpa [#allocation8], 1 }
 0x1f8   :  { %132 = vsyncpa [#allocation10], 1 }

</bundles_post_ra>
